<compile_context>
chip_gen: v5e
topology: v5e:2x2
jax: 0.10.0
libtpu: 0.0.40
codegen_flags: <defaults>
</compile_context>

<pallas_src>
import jax
import jax.numpy as jnp
from jax.experimental import pallas as pl
from jax.experimental.pallas import tpu as pltpu

LANE = 128            # lane width: feature dims are padded to this for dense stores
HIDDEN = 64           # true hidden width fixed by the PyTorch QNetwork
DEFAULT_TILE_B = 512  # batch rows per grid step for large batches


def _round_up(n, m):
    return ((n + m - 1) // m) * m


def qnet_kernel(x_ref, w1_ref, w2_ref, w3_ref, b_ref, o_ref):
    """One batch tile: relu(x@W1+b1) -> relu(.@W2+b2) -> .@W3+b3 (lane-dense store)."""
    h_pad = w1_ref.shape[1]
    o_pad = w3_ref.shape[1]
    # static 128-aligned slices of the packed bias vector (no relayout cost)
    b1 = b_ref[:, :h_pad]
    b2 = b_ref[:, h_pad:2 * h_pad]
    b3 = b_ref[:, 2 * h_pad:2 * h_pad + o_pad]

    # fc1 + relu  (bf16 operands on the MXU, f32 accumulation + f32 VPU math)
    h1 = jnp.dot(x_ref[...], w1_ref[...], preferred_element_type=jnp.float32) + b1
    h1 = jnp.maximum(h1, 0.0)
    # fc2 + relu
    h2 = jnp.dot(h1.astype(w2_ref.dtype), w2_ref[...],
                 preferred_element_type=jnp.float32) + b2
    h2 = jnp.maximum(h2, 0.0)
    # fc3 (no activation); 128-lane-wide store, wrapper slices back to out_dim
    o_ref[...] = (jnp.dot(h2.astype(w3_ref.dtype), w3_ref[...],
                          preferred_element_type=jnp.float32) + b3).astype(o_ref.dtype)


def qnetwork_forward(x, params, *, tile_b=DEFAULT_TILE_B):
    """x: [B, input_dim] float32.  params from init_params (padded, bf16 weights)."""
    w1, w2, w3, b = params["w1"], params["w2"], params["w3"], params["b"]
    out_dim = params["out_dim"]
    B, in_dim = x.shape
    o_pad = w3.shape[1]

    # Batch tile: large enough to amortize the ~0.35us/grid-step overhead on
    # real batches, but never larger than the (8-aligned) batch itself.
    tb = min(tile_b, _round_up(B, 8))
    b_pad = _round_up(B, tb)
    if b_pad != B:
        x = jnp.pad(x, ((0, b_pad - B), (0, 0)))
    x = x.astype(w1.dtype)  # bf16 activations -> half the activation DMA bytes

    grid = (pl.cdiv(b_pad, tb),)
    out = pl.pallas_call(
        qnet_kernel,
        out_shape=jax.ShapeDtypeStruct((b_pad, o_pad), jnp.float32),
        grid=grid,
        in_specs=[
            pl.BlockSpec((tb, in_dim), lambda i: (i, 0)),   # streamed per batch tile
            pl.BlockSpec(w1.shape, lambda i: (0, 0)),       # weights: VMEM-resident
            pl.BlockSpec(w2.shape, lambda i: (0, 0)),
            pl.BlockSpec(w3.shape, lambda i: (0, 0)),
            pl.BlockSpec(b.shape, lambda i: (0, 0)),        # packed biases (1 DMA)
        ],
        out_specs=pl.BlockSpec((tb, o_pad), lambda i: (i, 0)),
        compiler_params=pltpu.CompilerParams(
            dimension_semantics=("parallel",),  # megacore-shard batch on v7x
            vmem_limit_bytes=48 << 20,          # safe on v5e/v6e/v7x; kernel needs far less
        ),
    )(x, w1, w2, w3, b)
    return out[:B, :out_dim]


def init_params(key, input_dim, output_dim, hidden_dim=HIDDEN):
    """PyTorch-style uniform(+-1/sqrt(fan_in)) init on the true shapes, then
    zero-padded to 128-lane feature dims.  Weights bf16 (MXU), biases f32 (packed)."""
    h_pad = _round_up(hidden_dim, LANE)
    o_pad = _round_up(output_dim, LANE)
    ks = jax.random.split(key, 6)

    def linear(kw, kb, fan_in, fan_out, in_pad, out_pad):
        bound = 1.0 / jnp.sqrt(jnp.float32(fan_in))
        w = jax.random.uniform(kw, (fan_in, fan_out), jnp.float32, -bound, bound)
        bvec = jax.random.uniform(kb, (fan_out,), jnp.float32, -bound, bound)
        # zero padding keeps the math identical to the unpadded network
        w = jnp.pad(w, ((0, in_pad - fan_in), (0, out_pad - fan_out)))
        bvec = jnp.pad(bvec, (0, out_pad - fan_out))
        return w, bvec

    w1, b1 = linear(ks[0], ks[1], input_dim, hidden_dim, input_dim, h_pad)
    w2, b2 = linear(ks[2], ks[3], hidden_dim, hidden_dim, h_pad, h_pad)
    w3, b3 = linear(ks[4], ks[5], hidden_dim, output_dim, h_pad, o_pad)

    return {
        "w1": w1.astype(jnp.bfloat16),
        "w2": w2.astype(jnp.bfloat16),
        "w3": w3.astype(jnp.bfloat16),
        "b": jnp.concatenate([b1, b2, b3]).reshape(1, -1),  # (1, 2*h_pad+o_pad) f32
        "out_dim": output_dim,
    }


if __name__ == "__main__":
    key = jax.random.PRNGKey(0)
    k_x, k_p = jax.random.split(key)

    # small shapes consistent with the module: state dim 16, 4 actions, hidden 64
    batch, input_dim, output_dim = 8, 16, 4

    x = jax.random.normal(k_x, (batch, input_dim), dtype=jnp.float32)
    params = init_params(k_p, input_dim, output_dim)

    out = qnetwork_forward(x, params)
    jax.block_until_ready(out)
    assert out.shape == (batch, output_dim)

    # Reference: same bf16-operand / f32-accumulate path in plain JAX.
    w1, w2, w3 = params["w1"], params["w2"], params["w3"]
    h_pad, o_pad = w1.shape[1], w3.shape[1]
    bvec = params["b"][0]
    b1, b2, b3 = bvec[:h_pad], bvec[h_pad:2 * h_pad], bvec[2 * h_pad:2 * h_pad + o_pad]
    xb = x.astype(jnp.bfloat16)
    r1 = jnp.maximum(jnp.dot(xb, w1, preferred_element_type=jnp.float32) + b1, 0.0)
    r2 = jnp.maximum(jnp.dot(r1.astype(jnp.bfloat16), w2,
                             preferred_element_type=jnp.float32) + b2, 0.0)
    ref = (jnp.dot(r2.astype(jnp.bfloat16), w3,
                   preferred_element_type=jnp.float32) + b3)[:, :output_dim]
    assert jnp.allclose(out, ref, atol=1e-2, rtol=1e-2)

    print("KERNEL_OK")
</pallas_src>

<mosaic_0001>
module attributes {stable_mosaic.version = 11 : i64} {
  func.func @qnet_kernel(%arg0: i32, %arg1: memref<8x16xbf16, #tpu.memory_space<vmem>>, %arg2: memref<16x128xbf16, #tpu.memory_space<vmem>>, %arg3: memref<128x128xbf16, #tpu.memory_space<vmem>>, %arg4: memref<128x128xbf16, #tpu.memory_space<vmem>>, %arg5: memref<1x384xf32, #tpu.memory_space<vmem>>, %arg6: memref<8x128xf32, #tpu.memory_space<vmem>>) attributes {dimension_semantics = [#tpu.dimension_semantics<parallel>], iteration_bounds = array<i64: 1>, scalar_prefetch = 0 : i64, scratch_operands = 0 : i64, tpu.core_type = #tpu.core_type<tc>, window_params = [{transform_indices = @transform_0, window_bounds = array<i64: 8, 16>}, {pipeline_mode = #tpu.pipeline_mode<synchronous>, transform_indices = @transform_1, window_bounds = array<i64: 16, 128>}, {pipeline_mode = #tpu.pipeline_mode<synchronous>, transform_indices = @transform_2, window_bounds = array<i64: 128, 128>}, {pipeline_mode = #tpu.pipeline_mode<synchronous>, transform_indices = @transform_3, window_bounds = array<i64: 128, 128>}, {pipeline_mode = #tpu.pipeline_mode<synchronous>, transform_indices = @transform_4, window_bounds = array<i64: 1, 384>}, {transform_indices = @transform_5, window_bounds = array<i64: 8, 128>}]} {
    %c0 = arith.constant 0 : index
    %c0_0 = arith.constant 0 : index
    %0 = vector.load %arg5[%c0, %c0_0] : memref<1x384xf32, #tpu.memory_space<vmem>>, vector<1x128xf32>
    %c0_1 = arith.constant 0 : index
    %c128 = arith.constant 128 : index
    %1 = vector.load %arg5[%c0_1, %c128] : memref<1x384xf32, #tpu.memory_space<vmem>>, vector<1x128xf32>
    %c0_2 = arith.constant 0 : index
    %c256 = arith.constant 256 : index
    %2 = vector.load %arg5[%c0_2, %c256] : memref<1x384xf32, #tpu.memory_space<vmem>>, vector<1x128xf32>
    %c0_3 = arith.constant 0 : index
    %c0_4 = arith.constant 0 : index
    %3 = vector.load %arg1[%c0_3, %c0_4] : memref<8x16xbf16, #tpu.memory_space<vmem>>, vector<8x16xbf16>
    %c0_5 = arith.constant 0 : index
    %c0_6 = arith.constant 0 : index
    %4 = vector.load %arg2[%c0_5, %c0_6] : memref<16x128xbf16, #tpu.memory_space<vmem>>, vector<16x128xbf16>
    %cst = arith.constant dense<0.000000e+00> : vector<8x128xf32>
    %5 = tpu.matmul %3, %4, %cst {dimension_numbers = #tpu.dot_dimension_numbers<[1], [0], [0], [1], [0, 0, 1, 1], [], []>} : vector<8x16xbf16>, vector<16x128xbf16>, vector<8x128xf32> -> vector<8x128xf32>
    %6 = vector.broadcast %0 : vector<1x128xf32> to vector<8x128xf32>
    %7 = arith.addf %5, %6 : vector<8x128xf32>
    %cst_7 = arith.constant 0.000000e+00 : f32
    %8 = vector.broadcast %cst_7 : f32 to vector<8x128xf32>
    %9 = arith.maximumf %7, %8 : vector<8x128xf32>
    %10 = arith.truncf %9 : vector<8x128xf32> to vector<8x128xbf16>
    %c0_8 = arith.constant 0 : index
    %c0_9 = arith.constant 0 : index
    %11 = vector.load %arg3[%c0_8, %c0_9] : memref<128x128xbf16, #tpu.memory_space<vmem>>, vector<128x128xbf16>
    %cst_10 = arith.constant dense<0.000000e+00> : vector<8x128xf32>
    %12 = tpu.matmul %10, %11, %cst_10 {dimension_numbers = #tpu.dot_dimension_numbers<[1], [0], [0], [1], [0, 0, 1, 1], [], []>} : vector<8x128xbf16>, vector<128x128xbf16>, vector<8x128xf32> -> vector<8x128xf32>
    %13 = vector.broadcast %1 : vector<1x128xf32> to vector<8x128xf32>
    %14 = arith.addf %12, %13 : vector<8x128xf32>
    %cst_11 = arith.constant 0.000000e+00 : f32
    %15 = vector.broadcast %cst_11 : f32 to vector<8x128xf32>
    %16 = arith.maximumf %14, %15 : vector<8x128xf32>
    %17 = arith.truncf %16 : vector<8x128xf32> to vector<8x128xbf16>
    %c0_12 = arith.constant 0 : index
    %c0_13 = arith.constant 0 : index
    %18 = vector.load %arg4[%c0_12, %c0_13] : memref<128x128xbf16, #tpu.memory_space<vmem>>, vector<128x128xbf16>
    %cst_14 = arith.constant dense<0.000000e+00> : vector<8x128xf32>
    %19 = tpu.matmul %17, %18, %cst_14 {dimension_numbers = #tpu.dot_dimension_numbers<[1], [0], [0], [1], [0, 0, 1, 1], [], []>} : vector<8x128xbf16>, vector<128x128xbf16>, vector<8x128xf32> -> vector<8x128xf32>
    %20 = vector.broadcast %2 : vector<1x128xf32> to vector<8x128xf32>
    %21 = arith.addf %19, %20 : vector<8x128xf32>
    %c0_15 = arith.constant 0 : index
    %c0_16 = arith.constant 0 : index
    %22 = vector.load %arg6[%c0_15, %c0_16] : memref<8x128xf32, #tpu.memory_space<vmem>>, vector<8x128xf32>
    tpu.vector_store %arg6[%c0_15, %c0_16], %21 {strides = array<i32>} : memref<8x128xf32, #tpu.memory_space<vmem>>, vector<8x128xf32>,
    return
  }
  func.func @transform_0(%arg0: i32) -> (i32, i32) {
    %c0_i32 = arith.constant 0 : i32
    %c0_i32_0 = arith.constant 0 : i32
    return %arg0, %c0_i32 : i32, i32
  }
  func.func @transform_1(%arg0: i32) -> (i32, i32) {
    %c0_i32 = arith.constant 0 : i32
    %c0_i32_0 = arith.constant 0 : i32
    %c0_i32_1 = arith.constant 0 : i32
    return %c0_i32, %c0_i32_0 : i32, i32
  }
  func.func @transform_2(%arg0: i32) -> (i32, i32) {
    %c0_i32 = arith.constant 0 : i32
    %c0_i32_0 = arith.constant 0 : i32
    %c0_i32_1 = arith.constant 0 : i32
    return %c0_i32, %c0_i32_0 : i32, i32
  }
  func.func @transform_3(%arg0: i32) -> (i32, i32) {
    %c0_i32 = arith.constant 0 : i32
    %c0_i32_0 = arith.constant 0 : i32
    %c0_i32_1 = arith.constant 0 : i32
    return %c0_i32, %c0_i32_0 : i32, i32
  }
  func.func @transform_4(%arg0: i32) -> (i32, i32) {
    %c0_i32 = arith.constant 0 : i32
    %c0_i32_0 = arith.constant 0 : i32
    %c0_i32_1 = arith.constant 0 : i32
    return %c0_i32, %c0_i32_0 : i32, i32
  }
  func.func @transform_5(%arg0: i32) -> (i32, i32) {
    %c0_i32 = arith.constant 0 : i32
    %c0_i32_0 = arith.constant 0 : i32
    return %arg0, %c0_i32 : i32, i32
  }
}

</mosaic_0001>

<bundles_post_ra>
// kernel: tpu_custom_call.1
= control target key start
LH: loop header
LB: loop body
LE: loop exit
PB: predicated region body
PF: predicated region fallthrough
CT: control target
= control target key end

     0   :  { %10 = vsyncpa [#allocation3], 0  ;;  %s584_s0 = inlined_call_operand.hbm [shape: bf16[8,16], index: 0, kind: input, shape index: {}]   ;;  %s585_s1 = inlined_call_operand.hbm [shape: bf16[16,128], index: 1, kind: input, shape index: {}]   ;;  %s586_s2 = inlined_call_operand.hbm [shape: bf16[128,128], index: 2, kind: input, shape index: {}]   ;;  %s587_s3 = inlined_call_operand.hbm [shape: bf16[128,128], index: 3, kind: input, shape index: {}]   ;;  %s588_s4 = inlined_call_operand.vmem [shape: f32[1,384], index: 4, kind: input, shape index: {}]   ;;  %s589_s5 = inlined_call_operand.hbm [shape: f32[8,128], index: 5, kind: output, shape index: {}]  }
   0x1   :  { %11 = vsyncpa [#allocation6], 0 }
   0x2   :  { %12 = vsyncpa [#allocation9], 0  ;;  %s29_s20 = sshll.u32 %s585_s1, 4  ;;  %s30_s20 = int_to_ptr.hbm [resolvable:$true] %s29_s20 }
   0x3   :  { %13 = vsyncpa [#allocation4], 0  ;;  %s523_s21 = smov [#allocation5]   ;;  %s19_s25 = sshll.u32 %s584_s0, 4  ;;  %s20_s25 = int_to_ptr.hbm [resolvable:$true] %s19_s25 }
   0x4   :  { %s31_s22 = sshll.u32 %s523_s21, 4  ;;  %s524_s26 = smov 64   ;;  %s32_s22 = int_to_ptr.vmem [resolvable:$true] %s31_s22 }
   0x5   :  { %s525_s27 = smov 4   ;;  %s526_s28 = smov [#allocation2]  }
   0x6   :  { %37 = dma.hbm_to_vmem [thread:$0]  %s30_s20, 128, %s32_s22, [#allocation6], %s524_s26, %s524_s26, %s525_s27  }
   0x7   :  { %s21_s29 = sshll.u32 %s526_s28, 4  ;;  %s42_s7 = sshll.u32 %s586_s2, 4  ;;  %s22_s29 = int_to_ptr.vmem [resolvable:$true] %s21_s29  ;;  %s43_s7 = int_to_ptr.hbm [resolvable:$true] %s42_s7 }
   0x8   :  { %24 = dma.hbm_to_vmem [thread:$0]  %s20_s25, 64, %s22_s29, [#allocation3]  }
   0x9   :  { %s55_s9 = sshll.u32 %s587_s3, 4  ;;  %s527_s10 = smov [#allocation7]   ;;  %s56_s9 = int_to_ptr.hbm [resolvable:$true] %s55_s9 }
   0xa   :  { %s44_s11 = sshll.u32 %s527_s10, 4  ;;  %s528_s0 = smov [#allocation8]   ;;  %s45_s11 = int_to_ptr.vmem [resolvable:$true] %s44_s11 }
   0xb   :  { %50 = dma.hbm_to_vmem [thread:$0]  %s43_s7, 1024, %s45_s11, [#allocation6], %s524_s26, %s524_s26, %s525_s27  }
   0xc   :  { %s57_s12 = sshll.u32 %s528_s0, 4  ;;  %s58_s12 = int_to_ptr.vmem [resolvable:$true] %s57_s12 }
   0xd   :  { %63 = dma.hbm_to_vmem [thread:$0]  %s56_s9, 1024, %s58_s12, [#allocation9], %s524_s26, %s524_s26, %s525_s27  }
   0xe   :  { %515 = dma.done.wait [#allocation3], 64  }
   0xf   :  { %516 = vsyncadd [#allocation3], 4294967232 }
  0x10   :  { %517 = dma.done.wait [#allocation6], 1152  }
  0x11   :  { %518 = vsyncadd [#allocation6], 4294966144 }
  0x12   :  { %519 = dma.done.wait [#allocation9], 1024  }
  0x13   :  { %520 = vsyncadd [#allocation9], 4294966272  ;;  %v368_v0 = vld [vmem:[#allocation5] sm:$0xff]  ;;  %v86_v2 = vld [vmem:[#allocation2] sm:$0xf]  ;;  %vm98_vm0 = vcmask 130048  }
  0x14   :  { %v376_v1 = vld [vmem:[#allocation7 + $0x38] sm:$0xff]  ;;  %109 = vmatpush.bf16.msra.mxu0 %v368_v0  ;;  %v375_v3 = vld [vmem:[#allocation7 + $0x30] sm:$0xff]  ;;  %v374_v4 = vld [vmem:[#allocation7 + $0x28] sm:$0xff]  ;;  %s529_s17 = smov [#allocation10]   ;;  %s287_s21 = sshll.u32 %s589_s5, 4  ;;  %s288_s21 = int_to_ptr.hbm [resolvable:$true] %s287_s21 }
  0x15   :  { %184 = vmatpush.bf16.msra.mxu1 %v376_v1  ;;  %v373_v5 = vld [vmem:[#allocation7 + $0x20] sm:$0xff]  ;;  %v372_v6 = vld [vmem:[#allocation7 + $0x18] sm:$0xff]  ;;  %v371_v7 = vld [vmem:[#allocation7 + $0x10] sm:$0xff]  ;;  %s285_s18 = sshll.u32 %s529_s17, 4  ;;  %s286_s18 = int_to_ptr.vmem [resolvable:$true] %s285_s18 }
  0x16   :  { %v370_v8 = vld [vmem:[#allocation7 + $0x8] sm:$0xff]  ;;  %v369_v9 = vld [vmem:[#allocation7] sm:$0xff]  ;;  %v384_v10 = vld [vmem:[#allocation8 + $0x38] sm:$0xff] }
  0x17   :  { %303 = vmatmul.msk.bf16.vlgmr.msra.gmra.mxu0 %vm98_vm0, %v86_v2  ;;  %266 = vmatpush.bf16.msra.mxu2 %v384_v10  ;;  %v383_v11 = vld [vmem:[#allocation8 + $0x30] sm:$0xff]  ;;  %v382_v12 = vld [vmem:[#allocation8 + $0x28] sm:$0xff]  ;;  %v381_v13 = vld [vmem:[#allocation8 + $0x20] sm:$0xff] }
  0x18   :  { %v380_v14 = vld [vmem:[#allocation8 + $0x18] sm:$0xff]  ;;  %v379_v15 = vld [vmem:[#allocation8 + $0x10] sm:$0xff]  ;;  %v378_v22 = vld [vmem:[#allocation8 + $0x8] sm:$0xff] }
  0x19   :  { %185 = vmatpush.bf16.msra.mxu1 %v375_v3  ;;  %v392_v16 = vld [vmem:[%s588_s4] ss:$0 sm:$0xff]  ;;  %v377_v23 = vld [vmem:[#allocation8] sm:$0xff]  ;;  %v393_v24 = vld [vmem:[%s588_s4 + $0x1] ss:$0 sm:$0xff] }
  0x1a   :  { %v394_v30 = vld [vmem:[%s588_s4 + $0x2] ss:$0 sm:$0xff] }
  0x1b   :  { %267 = vmatpush.bf16.msra.mxu2 %v383_v11 }
  0x1d   :  { %186 = vmatpush.bf16.msra.mxu1 %v374_v4 }
  0x1f   :  { %268 = vmatpush.bf16.msra.mxu2 %v382_v12 }
  0x21   :  { %187 = vmatpush.bf16.msra.mxu1 %v373_v5 }
  0x23   :  { %269 = vmatpush.bf16.msra.mxu2 %v381_v13 }
  0x25   :  { %188 = vmatpush.bf16.msra.mxu1 %v372_v6 }
  0x27   :  { %270 = vmatpush.bf16.msra.mxu2 %v380_v14 }
  0x29   :  { %189 = vmatpush.bf16.msra.mxu1 %v371_v7 }
  0x2b   :  { %271 = vmatpush.bf16.msra.mxu2 %v379_v15 }
  0x2d   :  { %190 = vmatpush.bf16.msra.mxu1 %v370_v8 }
  0x2f   :  { %272 = vmatpush.bf16.msra.mxu2 %v378_v22 }
  0x31   :  { %191 = vmatpush.bf16.msra.mxu1 %v369_v9 }
  0x33   :  { %273 = vmatpush.bf16.msra.mxu2 %v377_v23 }
  0x94   :  { %v111_v17 = vpop.f32.mrf.mxu0 }
  0x95   :  { %v112_v18 = vadd.f32 %v392_v16, %v111_v17 }
  0x97   :  { %v115_v19 = vmax.f32 %v112_v18, 0.0 }
  0x99   :  { %v116_v20 = vpack.c.bf16 %v115_v19, %v115_v19 }
  0x9b   :  { %192 = vmatmul.bf16.vlgmr.msra.gmra.mxu1 %v116_v20 }
  0x9c   :  { %v113_v21 = vpop.f32.mrf.mxu0 }
 0x118   :  { %v193_v25 = vpop.f32.mrf.mxu1 }
 0x119   :  { %v194_v26 = vadd.f32 %v393_v24, %v193_v25 }
 0x11b   :  { %v197_v27 = vmax.f32 %v194_v26, 0.0 }
 0x11d   :  { %v198_v28 = vpack.c.bf16 %v197_v27, %v197_v27 }
 0x11f   :  { %274 = vmatmul.bf16.vlgmr.msra.gmra.mxu2 %v198_v28 }
 0x120   :  { %v195_v29 = vpop.f32.mrf.mxu1 }
 0x1a2   :  { %v275_v31 = vpop.f32.mrf.mxu2 }
 0x1a3   :  { %v276_v32 = vadd.f32 %v394_v30, %v275_v31 }
 0x1a5   :  { %279 = vst [vmem:[#allocation10] sm:$0xff] %v276_v32 }
 0x1a6   :  { %290 = dma.vmem_to_hbm [thread:$0]  %s286_s18, 128, %s288_s21, [#allocation4]  }
 0x1aa   :  { %v277_v33 = vpop.f32.mrf.mxu2 }
 0x1ab   :  { %521 = dma.done.wait [#allocation4], 128  }
 0x1ac   :  { %522 = vsyncadd [#allocation4], 4294967168 }
 0x1ad   :  { %295 = vsyncpa [#allocation3], 1 }
 0x1ae   :  { %296 = vsyncpa [#allocation6], 1 }
 0x1af   :  { %297 = vsyncpa [#allocation9], 1 }
 0x1b0   :  { %298 = vsyncpa [#allocation4], 1 }

</bundles_post_ra>
